<compile_context>
chip_gen: v7x
topology: tpu7x:2x2x1
jax: 0.10.0
libtpu: 0.0.40
codegen_flags: <defaults>
</compile_context>

<pallas_src>
import jax
import jax.numpy as jnp
from jax.experimental import pallas as pl
from jax.experimental.pallas import tpu as pltpu


# ----------------------------------------------------------------------------
# Glue: bilinear interpolation matrix (torchvision Resize, align_corners=False,
# antialias=False semantics).
# ----------------------------------------------------------------------------
def bilinear_interp_matrix(in_size: int, out_size: int) -> jnp.ndarray:
    scale = in_size / out_size
    coords = (jnp.arange(out_size, dtype=jnp.float32) + 0.5) * scale - 0.5
    coords = jnp.clip(coords, 0.0, in_size - 1)
    lo = jnp.floor(coords).astype(jnp.int32)
    hi = jnp.minimum(lo + 1, in_size - 1)
    w_hi = coords - lo.astype(jnp.float32)
    w_lo = 1.0 - w_hi
    m = jnp.zeros((out_size, in_size), dtype=jnp.float32)
    rows = jnp.arange(out_size)
    m = m.at[rows, lo].add(w_lo)
    m = m.at[rows, hi].add(w_hi)
    return m


# ----------------------------------------------------------------------------
# Kernel factory: B image planes (same channel) per grid step.
# ----------------------------------------------------------------------------
def _make_kernel(b: int, h_in: int, w_in: int, h_out: int, w_out: int,
                 batched_width: bool):
    def kernel(shift_ref, scale_ref, x_ref, rh_ref, rwt_ref, o_ref):
        # shift_ref / scale_ref: (C,) f32 in SMEM (scalar prefetch)
        # x_ref:  (B, 1, H_in, W_in)   f32   (cast to bf16 in-kernel)
        # rh_ref: (H_out, H_in)        f32
        # rwt_ref:(W_in, W_out)        bf16
        # o_ref:  (B, 1, H_out, W_out) f32
        ch = pl.program_id(1)
        scale = scale_ref[ch]          # 1 / std[c]
        shift = shift_ref[ch]          # -mean[c] / std[c]
        rh = rh_ref[...]
        rwt = rwt_ref[...]
        if batched_width:
            # Width resize of all B planes as ONE large-M MXU matmul.
            xf = x_ref[...].reshape(b * h_in, w_in).astype(jnp.bfloat16)
            t = jnp.dot(xf, rwt, preferred_element_type=jnp.float32)
            t = t.reshape(b, h_in, w_out)
            for j in range(b):
                # Height resize in f32 (no extra bf16 rounding of the
                # intermediate); fused per-channel affine normalization.
                y = jnp.dot(rh, t[j], preferred_element_type=jnp.float32)
                o_ref[j, 0] = (y * scale + shift).astype(o_ref.dtype)
        else:
            # Fallback when H_in is not a multiple of 8 (reshape not free).
            for j in range(b):
                xj = x_ref[j, 0].astype(jnp.bfloat16)
                tj = jnp.dot(xj, rwt, preferred_element_type=jnp.float32)
                y = jnp.dot(rh, tj, preferred_element_type=jnp.float32)
                o_ref[j, 0] = (y * scale + shift).astype(o_ref.dtype)
    return kernel


# ----------------------------------------------------------------------------
# Wrapper
# ----------------------------------------------------------------------------
def pre_processor_forward(
    batch: jnp.ndarray,                # (N, C, H_in, W_in), NCHW, float
    out_hw: tuple[int, int],
    mean: jnp.ndarray,                 # (C,)
    std: jnp.ndarray,                  # (C,)
    *,
    max_planes_per_step: int = 8,
    out_dtype=jnp.float32,             # pass jnp.bfloat16 if the consumer is bf16
) -> jnp.ndarray:
    n, c, h_in, w_in = batch.shape
    h_out, w_out = out_hw

    # Interpolation matrices (glue, built once).  Width weights feed the MXU in
    # bf16; height weights stay f32 (second matmul runs in f32).
    rh = bilinear_interp_matrix(h_in, h_out)                       # (H_out, H_in)
    rwt = bilinear_interp_matrix(w_in, w_out).T.astype(jnp.bfloat16)  # (W_in, W_out)

    # Per-channel affine normalization folded to scale/shift scalars (SMEM).
    scale = (1.0 / std).astype(jnp.float32)
    shift = (-mean / std).astype(jnp.float32)

    # --- Per-generation VMEM limit --------------------------------------
    try:
        vmem_cap = int(pltpu.get_tpu_info().vmem_capacity_bytes)
    except Exception:  # pragma: no cover - conservative fallback
        vmem_cap = 64 << 20
    vmem_limit = (64 << 20) if vmem_cap >= (100 << 20) else (48 << 20)
    vmem_limit = min(vmem_limit, (vmem_cap * 3) // 4)

    # --- Plane batch B against the VMEM budget ---------------------------
    lanes = lambda x: pl.cdiv(x, 128) * 128
    subl = lambda x: pl.cdiv(x, 8) * 8
    fixed = (subl(h_out) * lanes(h_in) * 4 * 2          # rh blocks, double-buffered
             + subl(w_in) * lanes(w_out) * 2 * 2        # rwt blocks (bf16), double-buffered
             + subl(h_out) * lanes(w_out) * 4)          # per-plane y temporary
    per_plane = (subl(h_in) * lanes(w_in) * (4 * 2 + 2)     # f32 input x2 bufs + bf16 copy
                 + subl(h_out) * lanes(w_out) * 4 * 2       # output x2 bufs
                 + subl(h_in) * lanes(w_out) * 4)           # f32 intermediate t
    budget = vmem_limit - fixed - (4 << 20)                 # headroom
    b = max(1, min(n, max_planes_per_step, budget // max(per_plane, 1)))

    # Keep the total number of grid steps even (when possible) so v7x's two
    # TensorCores stay balanced across the two "parallel" grid axes.
    if n > 1 and (pl.cdiv(n, b) * c) % 2 == 1:
        b = pl.cdiv(n, pl.cdiv(n, b) + 1)

    grid = (pl.cdiv(n, b), c)            # ragged tail handled by Pallas masking
    batched_width = (h_in % 8 == 0)
    kernel = _make_kernel(b, h_in, w_in, h_out, w_out, batched_width)

    out = pl.pallas_call(
        kernel,
        out_shape=jax.ShapeDtypeStruct((n, c, h_out, w_out), out_dtype),
        grid_spec=pltpu.PrefetchScalarGridSpec(
            num_scalar_prefetch=2,
            grid=grid,
            in_specs=[
                pl.BlockSpec((b, 1, h_in, w_in),
                             lambda nb, ch, sh, sc: (nb, ch, 0, 0)),
                pl.BlockSpec((h_out, h_in),
                             lambda nb, ch, sh, sc: (0, 0)),
                pl.BlockSpec((w_in, w_out),
                             lambda nb, ch, sh, sc: (0, 0)),
            ],
            out_specs=pl.BlockSpec((b, 1, h_out, w_out),
                                   lambda nb, ch, sh, sc: (nb, ch, 0, 0)),
        ),
        compiler_params=pltpu.CompilerParams(
            dimension_semantics=("parallel", "parallel"),
            vmem_limit_bytes=vmem_limit,
        ),
    )(shift, scale, batch.astype(jnp.float32), rh, rwt)
    return out


# ----------------------------------------------------------------------------
# Plain-JAX reference (inputs and width weights quantized to bf16 like the
# kernel's MXU feeds; everything else in f32, matching the kernel).
# ----------------------------------------------------------------------------
def _reference(batch, out_hw, mean, std):
    h_in, w_in = batch.shape[-2:]
    h_out, w_out = out_hw
    rh = bilinear_interp_matrix(h_in, h_out)
    rw = bilinear_interp_matrix(w_in, w_out).astype(jnp.bfloat16).astype(jnp.float32)
    xb = batch.astype(jnp.bfloat16).astype(jnp.float32)
    y = jnp.einsum("pw,nchw->nchp", rw, xb)   # width resize
    y = jnp.einsum("oh,nchp->ncop", rh, y)    # height resize
    return (y - mean[None, :, None, None]) / std[None, :, None, None]


if __name__ == "__main__":
    key = jax.random.PRNGKey(0)
    N, C, H, W = 4, 3, 16, 16
    OUT_HW = (32, 32)

    x = jax.random.uniform(key, (N, C, H, W), dtype=jnp.float32)
    mean = jnp.array([0.485, 0.456, 0.406], dtype=jnp.float32)
    std = jnp.array([0.229, 0.224, 0.225], dtype=jnp.float32)

    out = pre_processor_forward(x, OUT_HW, mean, std)
    out = jax.block_until_ready(out)

    ref = _reference(x, OUT_HW, mean, std)
    assert out.shape == (N, C, OUT_HW[0], OUT_HW[1])
    err = float(jnp.max(jnp.abs(out - ref)))
    assert jnp.allclose(out, ref, atol=2e-2, rtol=2e-2), f"max abs err = {err}"

    # TODO(synk): the identity path (transform=None) is trivial passthrough and
    # needs no kernel; only the Resize(antialias=False)+Normalize export
    # transform is kernelized (antialias=True resize is not implemented).
    print("KERNEL_OK")
</pallas_src>

<mosaic_0001>
module attributes {stable_mosaic.version = 11 : i64} {
  func.func @kernel(%arg0: i32, %arg1: i32, %arg2: memref<3xf32, #tpu.memory_space<smem>>, %arg3: memref<3xf32, #tpu.memory_space<smem>>, %arg4: memref<2x1x16x16xf32, #tpu.memory_space<vmem>>, %arg5: memref<32x16xf32, #tpu.memory_space<vmem>>, %arg6: memref<16x32xbf16, #tpu.memory_space<vmem>>, %arg7: memref<2x1x32x32xf32, #tpu.memory_space<vmem>>) attributes {dimension_semantics = [#tpu.dimension_semantics<parallel>, #tpu.dimension_semantics<parallel>], iteration_bounds = array<i64: 2, 3>, scalar_prefetch = 2 : i64, scratch_operands = 0 : i64, tpu.core_type = #tpu.core_type<tc>, window_params = [{transform_indices = @transform_0, window_bounds = array<i64: 2, 1, 16, 16>}, {pipeline_mode = #tpu.pipeline_mode<synchronous>, transform_indices = @transform_1, window_bounds = array<i64: 32, 16>}, {pipeline_mode = #tpu.pipeline_mode<synchronous>, transform_indices = @transform_2, window_bounds = array<i64: 16, 32>}, {transform_indices = @transform_3, window_bounds = array<i64: 2, 1, 32, 32>}]} {
    %0 = arith.index_cast %arg1 : i32 to index
    %1 = memref.load %arg3[%0] : memref<3xf32, #tpu.memory_space<smem>>
    %2 = arith.index_cast %arg1 : i32 to index
    %3 = memref.load %arg2[%2] : memref<3xf32, #tpu.memory_space<smem>>
    %c0 = arith.constant 0 : index
    %c0_0 = arith.constant 0 : index
    %4 = vector.load %arg5[%c0, %c0_0] : memref<32x16xf32, #tpu.memory_space<vmem>>, vector<32x16xf32>
    %c0_1 = arith.constant 0 : index
    %c0_2 = arith.constant 0 : index
    %5 = vector.load %arg6[%c0_1, %c0_2] : memref<16x32xbf16, #tpu.memory_space<vmem>>, vector<16x32xbf16>
    %c0_3 = arith.constant 0 : index
    %c0_4 = arith.constant 0 : index
    %c0_5 = arith.constant 0 : index
    %c0_6 = arith.constant 0 : index
    %6 = vector.load %arg4[%c0_3, %c0_4, %c0_5, %c0_6] : memref<2x1x16x16xf32, #tpu.memory_space<vmem>>, vector<2x1x16x16xf32>
    %7 = vector.shape_cast %6 : vector<2x1x16x16xf32> to vector<32x16xf32>
    %8 = arith.truncf %7 : vector<32x16xf32> to vector<32x16xbf16>
    %cst = arith.constant dense<0.000000e+00> : vector<32x32xf32>
    %9 = tpu.matmul %8, %5, %cst {dimension_numbers = #tpu.dot_dimension_numbers<[1], [0], [0], [1], [0, 0, 1, 1], [], []>} : vector<32x16xbf16>, vector<16x32xbf16>, vector<32x32xf32> -> vector<32x32xf32>
    %10 = vector.shape_cast %9 : vector<32x32xf32> to vector<2x16x32xf32>
    %11 = vector.extract_strided_slice %10 {offsets = [0, 0, 0], sizes = [1, 16, 32], strides = [1, 1, 1]} : vector<2x16x32xf32> to vector<1x16x32xf32>
    %12 = vector.shape_cast %11 : vector<1x16x32xf32> to vector<16x32xf32>
    %cst_7 = arith.constant dense<0.000000e+00> : vector<32x32xf32>
    %13 = tpu.matmul %4, %12, %cst_7 {dimension_numbers = #tpu.dot_dimension_numbers<[1], [0], [0], [1], [0, 0, 1, 1], [], []>} : vector<32x16xf32>, vector<16x32xf32>, vector<32x32xf32> -> vector<32x32xf32>
    %14 = vector.broadcast %1 : f32 to vector<32x32xf32>
    %15 = arith.mulf %13, %14 : vector<32x32xf32>
    %16 = vector.broadcast %3 : f32 to vector<32x32xf32>
    %17 = arith.addf %15, %16 : vector<32x32xf32>
    %c0_8 = arith.constant 0 : index
    %c0_9 = arith.constant 0 : index
    %c0_10 = arith.constant 0 : index
    %c0_11 = arith.constant 0 : index
    %18 = vector.load %arg7[%c0_8, %c0_9, %c0_10, %c0_11] : memref<2x1x32x32xf32, #tpu.memory_space<vmem>>, vector<1x1x32x32xf32>
    %19 = vector.shape_cast %18 : vector<1x1x32x32xf32> to vector<32x32xf32>
    %20 = vector.shape_cast %17 : vector<32x32xf32> to vector<1x1x32x32xf32>
    tpu.vector_store %arg7[%c0_8, %c0_9, %c0_10, %c0_11], %20 {strides = array<i32>} : memref<2x1x32x32xf32, #tpu.memory_space<vmem>>, vector<1x1x32x32xf32>,
    %21 = vector.extract_strided_slice %10 {offsets = [1, 0, 0], sizes = [1, 16, 32], strides = [1, 1, 1]} : vector<2x16x32xf32> to vector<1x16x32xf32>
    %22 = vector.shape_cast %21 : vector<1x16x32xf32> to vector<16x32xf32>
    %cst_12 = arith.constant dense<0.000000e+00> : vector<32x32xf32>
    %23 = tpu.matmul %4, %22, %cst_12 {dimension_numbers = #tpu.dot_dimension_numbers<[1], [0], [0], [1], [0, 0, 1, 1], [], []>} : vector<32x16xf32>, vector<16x32xf32>, vector<32x32xf32> -> vector<32x32xf32>
    %24 = vector.broadcast %1 : f32 to vector<32x32xf32>
    %25 = arith.mulf %23, %24 : vector<32x32xf32>
    %26 = vector.broadcast %3 : f32 to vector<32x32xf32>
    %27 = arith.addf %25, %26 : vector<32x32xf32>
    %c1 = arith.constant 1 : index
    %c0_13 = arith.constant 0 : index
    %c0_14 = arith.constant 0 : index
    %c0_15 = arith.constant 0 : index
    %28 = vector.load %arg7[%c1, %c0_13, %c0_14, %c0_15] : memref<2x1x32x32xf32, #tpu.memory_space<vmem>>, vector<1x1x32x32xf32>
    %29 = vector.shape_cast %28 : vector<1x1x32x32xf32> to vector<32x32xf32>
    %30 = vector.shape_cast %27 : vector<32x32xf32> to vector<1x1x32x32xf32>
    tpu.vector_store %arg7[%c1, %c0_13, %c0_14, %c0_15], %30 {strides = array<i32>} : memref<2x1x32x32xf32, #tpu.memory_space<vmem>>, vector<1x1x32x32xf32>,
    return
  }
  func.func @transform_0(%arg0: i32, %arg1: i32, %arg2: memref<3xf32, #tpu.memory_space<smem>>, %arg3: memref<3xf32, #tpu.memory_space<smem>>) -> (i32, i32, i32, i32) {
    %c0_i32 = arith.constant 0 : i32
    %c0_i32_0 = arith.constant 0 : i32
    %c0_i32_1 = arith.constant 0 : i32
    return %arg0, %arg1, %c0_i32, %c0_i32_0 : i32, i32, i32, i32
  }
  func.func @transform_1(%arg0: i32, %arg1: i32, %arg2: memref<3xf32, #tpu.memory_space<smem>>, %arg3: memref<3xf32, #tpu.memory_space<smem>>) -> (i32, i32) {
    %c0_i32 = arith.constant 0 : i32
    %c0_i32_0 = arith.constant 0 : i32
    %c0_i32_1 = arith.constant 0 : i32
    return %c0_i32, %c0_i32_0 : i32, i32
  }
  func.func @transform_2(%arg0: i32, %arg1: i32, %arg2: memref<3xf32, #tpu.memory_space<smem>>, %arg3: memref<3xf32, #tpu.memory_space<smem>>) -> (i32, i32) {
    %c0_i32 = arith.constant 0 : i32
    %c0_i32_0 = arith.constant 0 : i32
    %c0_i32_1 = arith.constant 0 : i32
    return %c0_i32, %c0_i32_0 : i32, i32
  }
  func.func @transform_3(%arg0: i32, %arg1: i32, %arg2: memref<3xf32, #tpu.memory_space<smem>>, %arg3: memref<3xf32, #tpu.memory_space<smem>>) -> (i32, i32, i32, i32) {
    %c0_i32 = arith.constant 0 : i32
    %c0_i32_0 = arith.constant 0 : i32
    %c0_i32_1 = arith.constant 0 : i32
    return %arg0, %arg1, %c0_i32, %c0_i32_0 : i32, i32, i32, i32
  }
}

</mosaic_0001>

<bundles_post_ra>
// kernel: tpu_custom_call.1
= control target key start
LH: loop header
LB: loop body
LE: loop exit
PB: predicated region body
PF: predicated region fallthrough
CT: control target
= control target key end

     0   :  { %s1206_s0 = inlined_call_operand.vmem [shape: f32[3], index: 0, kind: input, shape index: {}]   ;;  %s1207_s2 = inlined_call_operand.hbm [shape: f32[4,3,16,16], index: 2, kind: input, shape index: {}]   ;;  %s1208_s3 = inlined_call_operand.vmem [shape: f32[32,16], index: 3, kind: input, shape index: {}]   ;;  %s1209_s4 = inlined_call_operand.vmem [shape: bf16[16,32], index: 4, kind: input, shape index: {}]   ;;  %s1210_s5 = inlined_call_operand.hbm [shape: f32[4,3,32,32], index: 5, kind: output, shape index: {}]   ;;  %s1211_s1 = inlined_call_operand.vmem [shape: f32[3], index: 1, kind: input, shape index: {}]  }
   0x1   :  { %s10_s20 = sshll.u32 %s1206_s0, 4  ;;  %s14_s23 = sshll.u32 %s1211_s1, 4  ;;  %s11_s20 = int_to_ptr.vmem [resolvable:$true] %s10_s20  ;;  %s15_s23 = int_to_ptr.vmem [resolvable:$true] %s14_s23 }
   0x2   :  { %s861_s24 = scalar_lea.vmem %s11_s20, 16  ;;  %p866_p1 = scmp.lt.s32.totalorder %s11_s20, %s11_s20 }
   0x3   :  { %p862_p0 = scmp.ne.s32.totalorder %s11_s20, %s861_s24  ;;  %p867_p2 = scmp.lt.s32.totalorder %s861_s24, %s861_s24 }
   0x5   :  { %p868_p3 = por %p867_p2, %p866_p1 }
   0x7   :  { %p869_p4 = pnand %p868_p3, %p862_p0 }
   0x9   :  { %872 = shalt.err (!%p869_p4)  }
   0xa   :  { %s959_s25 = smov [#allocation3]   ;;  %s873_s26 = scalar_lea.vmem %s15_s23, 16 }
   0xb   :  { %13 = dma.vmem_to_smem %s11_s20, 16, %s959_s25, [#allocation2] }
   0xc   :  { %p874_p5 = scmp.ne.s32.totalorder %s15_s23, %s873_s26  ;;  %p878_p6 = scmp.lt.s32.totalorder %s15_s23, %s15_s23 }
   0xd   :  { %p879_p7 = scmp.lt.s32.totalorder %s873_s26, %s873_s26 }
   0xf   :  { %p880_p8 = por %p879_p7, %p878_p6 }
  0x11   :  { %p881_p9 = pnand %p880_p8, %p874_p5 }
  0x13   :  { %884 = shalt.err (!%p881_p9)  }
  0x14   :  { %s960_s0 = smov [#allocation4]  }
  0x15   :  { %17 = dma.vmem_to_smem %s15_s23, 16, %s960_s0, [#allocation2] }
  0x16   :  { %917 = dma.done.wait [#allocation2], 32 }
  0x17   :  { %918 = vsyncadd [#allocation2], 4294967264 }
  0x18   :  { %19 = sfence }
  0x19   :  { %20 = vsyncpa [#allocation6], 0 }
  0x1a   :  { %22 = vsyncpa [#allocation6 + $0x1], 0 }
  0x1b   :  { %23 = vsyncpa [#allocation7], 0 }
  0x1c   :  { %25 = vsyncpa [#allocation7 + $0x1], 0  ;;  %s1010_s1 = smov 0   ;;  %s1012_s27 = smov 0  }
  0x1d   :  { %s1014_s28 = smov 0   ;;  %s1016_s29 = smov 0  }
  0x1e   :  { %s1018_s30 = smov 0   ;;  %s1020_s6 = smov 0  }
  0x1f   :  { %s1022_s7 = smov 0   ;;  %s1024_s8 = smov 0  }
  0x20 LB: > { %1216 = sst [smem:[#allocation17_spill]] %s949_s6  ;;  %s670_s9 = sadd.s32 4294967295, %s957_s8   ;;  %s957_s8 = sphi %s1024_s8, %s31_s8   ;;  %s953_s7 = sphi %s1022_s7, %s1227_s7   ;;  %s949_s6 = sphi %s1020_s6, %s1226_s6   ;;  %s945_s30 = sphi %s1018_s30, %s1225_s30   ;;  %s941_s29 = sphi %s1016_s29, %s1224_s29   ;;  %s937_s28 = sphi %s1014_s28, %s1230_s28   ;;  %s933_s27 = sphi %s1012_s27, %s1229_s27   ;;  %s929_s1 = sphi %s1010_s1, %s1228_s1  }
  0x21   : > { %1217 = sst [smem:[#allocation18_spill]] %s953_s7  ;;  %s671_s10 = sadd.s32 4294967294, %s957_s8  }
  0x22   : > { %s40_s11 = sadd.s32 1, %s949_s6  ;;  %s43_s12 = sadd.s32 1, %s953_s7 }
  0x23   : > { %p41_p10 = scmp.ge.s32.totalorder %s40_s11, 3  ;;  %p59_p11 = scmp.ne.s32.totalorder %s937_s28, %s933_s27 }
  0x24   : > { %p60_p12 = scmp.eq.s32.totalorder %s957_s8, 0  ;;  %p65_p1 = scmp.ne.s32.totalorder %s933_s27, %s929_s1 }
  0x25   : > { %s1232_s11 = smov (%p41_p10, %s40_s11), 0  ;;  %s1234_s12 = smov (!%p41_p10, %s43_s12), %s953_s7 }
  0x26   : > { %1218 = sst [smem:[#allocation19_spill]] %s1232_s11  ;;  %s48_s13 = ssub.s32 %s949_s6, %s1232_s11 }
  0x27   : > { %p1062_p13 = por %p60_p12, %p59_p11  ;;  %p45_p0 = scmp.ge.s32.totalorder %s1234_s12, 2 }
  0x28   : > { %p66_p2 = scmp.eq.s32.totalorder %s670_s9, 0  ;;  %p133_p3 = scmp.eq.s32.totalorder %s670_s9, 5 }
  0x29   : > { %s1236_s12 = smov (%p45_p0, %s1234_s12), 0  ;;  %p139_p6 = scmp.eq.s32.totalorder %s671_s10, 5 }
  0x2a   : > { %1220 = sst [smem:[#allocation20_spill]] %s1236_s12  ;;  %p1070_p4 = por %p66_p2, %p65_p1 }
  0x2b   : > { %p1074_p5 = por %p133_p3, %p59_p11  ;;  %s47_s17 = ssub.s32 %s953_s7, %s1236_s12 }
  0x2c   : > { %s49_s18 = sor.u32 %s48_s13, %s47_s17  ;;  %s52_s19 = sadd.s32 1, %s937_s28 }
  0x2d   : > { %p50_p7 = scmp.eq.s32.totalorder %s49_s18, 0  ;;  %p1081_p8 = por %p139_p6, %p65_p1 }
  0x2e   : > { %p673_p9 = scmp.ge.s32.totalorder %s957_s8, 6 }
  0x2f   : > { %s1086_s21 = scalar_select %p50_p7, %s937_s28, %s52_s19  }
  0x30   : > { %161 = sbr.rel (%p673_p9) target bundleno = 70 (0x46), region = 24 }
  0x37   : > { %s165_s22 = sand.u32 1, %s937_s28   ;;  %s676_s23 = sshll.u32 %s949_s6, 1 }
  0x38   : > { %s674_s24 = sshll.u32 %s165_s22, 5  ;;  %s757_s25 = smul.u32 12, %s953_s7 }
  0x39   : > { %s759_s26 = scalar_select %p1062_p13, [#allocation0], [#allocation13] }
  0x3a   : > { %s176_s0 = sadd.s32 %s757_s25, %s676_s23  ;;  %s169_s9 = scalar_lea.vmem [#allocation5], %s674_s24 }
  0x3b   : > { %s191_s10 = sshll.u32 %s169_s9, 4  ;;  %s678_s13 = sshll.u32 %s176_s0, 7  ;;  %s192_s10 = int_to_ptr.vmem [resolvable:$true] %s191_s10 }
  0x3c   : > { %s183_s17 = sld [smem:[%s759_s26]]   ;;  %s178_s12 = scalar_lea.hbm %s1207_s2, %s678_s13 }
  0x3d   : > { %s961_s11 = smov 768   ;;  %s962_s7 = smov 256  }
  0x3e   : > { %760 = sst [smem:[#allocation10]] (%p1062_p13), %s961_s11  ;;  %s963_s6 = smov 2  }
  0x3f   : > { %761 = sst [smem:[#allocation10 + $0x1]] (%p1062_p13), %s962_s7  ;;  %s964_s24 = smov 128  }
  0x40   : > { %762 = sst [smem:[#allocation10 + $0x2]] (%p1062_p13), %s963_s6  ;;  %s965_s26 = smov 8  }
  0x41   : > { %763 = sst [smem:[#allocation10 + $0x3]] (%p1062_p13), %s964_s24  ;;  %s166_s0 = scalar_lea.sflag [#allocation6], %s165_s22 }
  0x42   : > { %s679_s23 = sshll.u32 %s183_s17, 26  ;;  %764 = sst [smem:[#allocation10 + $0x4]] (%p1062_p13), %s964_s24 }
  0x43   : > { %s680_s25 = sadd.s32 134217728, %s679_s23  ;;  %765 = sst [smem:[#allocation10 + $0x5]] (%p1062_p13), %s965_s26 }
  0x44   : > { %s966_s9 = smov [#allocation9]  }
  0x45   : > { %766 = dma.general (%p1062_p13), %s178_s12, 512, %s192_s10, %s166_s0, %s966_s9, [#allocation10], %s680_s25, 0  }
  0x46 PF: > { %p681_p10 = scmp.ge.s32.totalorder %s957_s8, 1  ;;  %p212_p11 = scmp.lt.s32.totalorder %s957_s8, 7 }
  0x48   : > { %p213_p12 = pnand %p681_p10, %p212_p11 }
  0x49   : > { %s1114_s6 = sand.u32 (!%p213_p12), 1, %s933_s27  }
  0x4a   : > { %216 = sbr.rel (%p213_p12) target bundleno = 545 (0x221), region = 32  ;;  %s682_s7 = sshll.u32 (!%p213_p12), %s1114_s6, 5 }
  0x4b   : > { %s219_s11 = scalar_lea.sflag (!%p213_p12), [#allocation6], %s1114_s6  ;;  %s222_s13 = scalar_lea.vmem (!%p213_p12), [#allocation5], %s682_s7 }
  0x51   : > { %920 = dma.done.wait (%p1070_p4), %s219_s11, 512  }
  0x52   : > { %922 = vsyncadd (%p1070_p4), %s219_s11, 4294966784  ;;  %v860_v0 = vld [vmem:[%s1209_s4] sm:$0xff]   ;;  %v257_v2 = vld [vmem:[%s222_s13 + $0x8] sm:$0xff]  ;;  %vm268_vm0 = vcmask 130048   ;;  %s248_s25 = sld [smem:[#allocation4 + %s941_s29]]  ;;  %s683_s0 = sshll.u32 %s1114_s6, 6 }
  0x53   : > { %v256_v1 = vld [vmem:[%s222_s13] sm:$0xff]  ;;  %v258_v3 = vld [vmem:[%s222_s13 + $0x10] sm:$0xff]  ;;  %721 = vmatprep.subr.bf16.mxu0 %v860_v0  ;;  %v259_v5 = vld [vmem:[%s222_s13 + $0x18] sm:$0xff]  ;;  %s249_s26 = sld [smem:[#allocation3 + %s941_s29]]  ;;  %vm431_vm1 = vcmask 261120   ;;  %s244_s9 = scalar_lea.vmem [#allocation8], %s683_s0 }
  0x54   : > { %v260_v4 = vpack.c.bf16 %v257_v2, %v256_v1  ;;  %722 = vmatpush3.bf16.msra.mxu0 %v860_v0  ;;  %v261_v6 = vpack.c.bf16 %v259_v5, %v258_v3  ;;  %v250_v7 = vld [vmem:[%s1208_s3] sm:$0xff]  ;;  %v251_v14 = vld [vmem:[%s1208_s3 + $0x8] sm:$0xff]  ;;  %v252_v15 = vld [vmem:[%s1208_s3 + $0x10] sm:$0xff]  ;;  %s535_s7 = scalar_lea.sflag [#allocation7], %s1114_s6 }
  0x55   : > { %731 = vmatprep.mubr.msk.f32.mxu1 %vm268_vm0, %v250_v7  ;;  %v253_v16 = vld [vmem:[%s1208_s3 + $0x18] sm:$0xff] }
  0x56   : > { %723 = vmatprep.mubr.msk.bf16.mxu0 %vm268_vm0, %v260_v4 }
  0x57   : > { %724 = vmatmul.mubr.msk.bf16.vlgmr.msra.gmra.mrb[0].mxu0 %vm268_vm0, %v261_v6 }
  0x58   : > { %741 = vmatprep.mubr.msk.f32.mxu0 %vm268_vm0, %v250_v7  ;;  %v421_v17 = vstv %s248_s25 }
  0x59   : > { %v426_v20 = vstv %s249_s26 }
 0x12a   : > { %v725_v8 = vpop.f32.mrb[0].mxu0 }
 0x12b   : > { %v309_v9 = vpop.f32.mrb[1].mxu0 }
 0x12c   : > { %v726_v10 = vpop.f32.mrb[2].mxu0 }
 0x12d   : > { %v751_v11 = vpack.c.bf16 %v726_v10, %v725_v8  ;;  %v312_v12 = vpop.f32.mrb[3].mxu0 }
 0x12e   : > { %v747_v13 = vpack.c.bf16 %v312_v12, %v309_v9 }
 0x12f   : > { %752 = vmatprep.subr.bf16.mxu0 %v751_v11 }
 0x130   : > { %748 = vmatprep.subr.bf16.mxu1 %v747_v13  ;;  %754 = vmatpush3.bf16.msra.mxu0 %v751_v11 }
 0x131   : > { %750 = vmatpush3.bf16.msra.mxu1 %v747_v13 }
 0x132   : > { %755 = vmatprep.subr.bf16.mxu1 %v751_v11 }
 0x133   : > { %742 = vmatmul.mubr.msk.f32.vlgmr.msra.gmra.mrb[4].mxu0 %vm268_vm0, %v251_v14 }
 0x134   : > { %732 = vmatmul.mubr.msk.f32.vlgmr.msra.gmra.mrb[0].mxu1 %vm268_vm0, %v251_v14 }
 0x135   : > { %756 = vmatpush3.bf16.msra.mxu1 %v751_v11  ;;  %734 = vmatprep.mubr.msk.f32.mxu1 %vm268_vm0, %v252_v15 }
 0x138   : > { %735 = vmatmul.mubr.msk.f32.gmra.mrb[2].mxu1 %vm268_vm0, %v253_v16 }
 0x139   : > { %744 = vmatprep.mubr.msk.f32.mxu1 %vm268_vm0, %v252_v15 }
 0x13c   : > { %745 = vmatmul.mubr.msk.f32.vlgmr.msra.gmra.mrb[4].mxu1 %vm268_vm0, %v253_v16 }
 0x206   : > { %v743_v18 = vpop.f32.mrb[4].mxu0 }
 0x207   : > { %v733_v19 = vpop.f32.mrb[0].mxu1  ;;  %v522_v21 = vmul.f32 %v743_v18, %v421_v17  ;;  %v502_v22 = vpop.f32.mrb[5].mxu0 }
 0x208   : > { %v423_v23 = vmul.f32 %v733_v19, %v421_v17  ;;  %v402_v24 = vpop.f32.mrb[1].mxu1  ;;  %v521_v25 = vmul.f32 %v502_v22, %v421_v17 }
 0x209   : > { %v422_v26 = vmul.f32 %v421_v17, %v402_v24  ;;  %v526_v27 = vadd.f32 %v522_v21, %v426_v20 }
 0x20a   : > { %v428_v28 = vadd.f32 %v426_v20, %v423_v23  ;;  %v525_v29 = vadd.f32 %v521_v25, %v426_v20 }
 0x20b   : > { %v427_v30 = vadd.f32 %v426_v20, %v422_v26  ;;  %v736_v31 = vpop.f32.mrb[2].mxu1  ;;  %696 = vst.msk [vmem:[%s244_s9 + $0x28] sm:$0xff] %vm431_vm1, %v526_v27 }
 0x20c   : > { %433 = vst.msk [vmem:[%s244_s9 + $0x8] sm:$0xff] %vm431_vm1, %v428_v28  ;;  %v425_v32 = vmul.f32 %v736_v31, %v421_v17  ;;  %v412_v33 = vpop.f32.mrb[3].mxu1  ;;  %695 = vst.msk [vmem:[%s244_s9 + $0x20] sm:$0xff] %vm431_vm1, %v525_v29 }
 0x20d   : > { %432 = vst.msk [vmem:[%s244_s9] sm:$0xff] %vm431_vm1, %v427_v30  ;;  %v424_v34 = vmul.f32 %v421_v17, %v412_v33 }
 0x20e   : > { %v430_v35 = vadd.f32 %v426_v20, %v425_v32 }
 0x20f   : > { %v429_v36 = vadd.f32 %v426_v20, %v424_v34  ;;  %v746_v37 = vpop.f32.mrb[4].mxu1 }
 0x210   : > { %435 = vst.msk [vmem:[%s244_s9 + $0x18] sm:$0xff] %vm431_vm1, %v430_v35  ;;  %v524_v38 = vmul.f32 %v746_v37, %v421_v17  ;;  %v512_v39 = vpop.f32.mrb[5].mxu1 }
 0x211   : > { %434 = vst.msk [vmem:[%s244_s9 + $0x10] sm:$0xff] %vm431_vm1, %v429_v36  ;;  %v523_v40 = vmul.f32 %v512_v39, %v421_v17 }
 0x212   : > { %v528_v41 = vadd.f32 %v524_v38, %v426_v20 }
 0x213   : > { %v527_v42 = vadd.f32 %v523_v40, %v426_v20 }
 0x214   : > { %698 = vst.msk [vmem:[%s244_s9 + $0x38] sm:$0xff] %vm431_vm1, %v528_v41 }
 0x215   : > { %697 = vst.msk [vmem:[%s244_s9 + $0x30] sm:$0xff] %vm431_vm1, %v527_v42 }
 0x216   : > { %s701_s11 = sshll.u32 %s941_s29, 2  ;;  %s758_s13 = smul.u32 24, %s945_s30 }
 0x217   : > { %s567_s12 = sshll.u32 %s244_s9, 4  ;;  %s967_s15 = smov 512   ;;  %s568_s12 = int_to_ptr.vmem [resolvable:$true] %s567_s12 }
 0x218   : > { %s548_s14 = sadd.s32 %s758_s13, %s701_s11  ;;  %768 = sst [smem:[#allocation12]] (%p1074_p5), %s967_s15 }
 0x219   : > { %s703_s22 = sshll.u32 %s548_s14, 7  ;;  %s968_s18 = smov 1536  }
 0x21a   : > { %s550_s17 = scalar_lea.hbm %s1210_s5, %s703_s22  ;;  %769 = sst [smem:[#allocation12 + $0x1]] (%p1074_p5), %s968_s18 }
 0x21b   : > { %s969_s19 = smov 4   ;;  %s970_s29 = smov 128  }
 0x21c   : > { %770 = sst [smem:[#allocation12 + $0x2]] (%p1074_p5), %s969_s19  ;;  %s971_s30 = smov 8  }
 0x21d   : > { %771 = sst [smem:[#allocation12 + $0x3]] (%p1074_p5), %s970_s29  ;;  %s972_s23 = smov [#allocation11]  }
 0x21e   : > { %772 = sst [smem:[#allocation12 + $0x4]] (%p1074_p5), %s970_s29  ;;  %s973_s24 = smov 0  }
 0x21f   : > { %773 = sst [smem:[#allocation12 + $0x5]] (%p1074_p5), %s971_s30 }
 0x220   : > { %774 = dma.general (%p1074_p5), %s568_s12, 1024, %s550_s17, %s535_s7, %s972_s23, [#allocation12], %s973_s24, 0  }
 0x221 PF: > { %p780_p13 = scmp.ge.s32.totalorder %s957_s8, 2  ;;  %s595_s25 = sand.u32 1, %s929_s1  }
 0x222   : > { %s596_s26 = scalar_lea.sflag [#allocation7], %s595_s25 }
 0x223   : > { %p777_p0 = pnand %p780_p13, %p1081_p8 }
 0x225   : > { %924 = dma.done.wait (!%p777_p0), %s596_s26, 1024  }
 0x226   : > { %926 = vsyncadd (!%p777_p0), %s596_s26, 4294966272  ;;  %s31_s8 = sadd.s32 1, %s957_s8   ;;  %s1224_s29 = sld [smem:[#allocation17_spill]] }
 0x227   : > { %p28_p1 = scmp.ge.s32.totalorder %s31_s8, 8   ;;  %s1225_s30 = sld [smem:[#allocation18_spill]] }
 0x228   : > { %s1226_s6 = sld [smem:[#allocation19_spill]]  ;;  %s1227_s7 = sld [smem:[#allocation20_spill]] }
 0x229   : > { %s1228_s1 = smov %s933_s27  ;;  %s1229_s27 = smov %s937_s28 }
 0x22a   : > { %s1230_s28 = smov %s1086_s21  ;;  %30 = sbr.rel (!%p28_p1) target bundleno = 32 (0x20), region = 88 }
 0x231   :  { %601 = vsyncpa [#allocation6], 1 }
 0x232   :  { %603 = vsyncpa [#allocation6 + $0x1], 1 }
 0x233   :  { %604 = vsyncpa [#allocation7], 1 }
 0x234   :  { %606 = vsyncpa [#allocation7 + $0x1], 1 }

</bundles_post_ra>
